<compile_context>
chip_gen: v5e
topology: v5e:2x2
jax: 0.10.0
libtpu: 0.0.40
codegen_flags: <defaults>
</compile_context>

<pallas_src>
import jax
import jax.numpy as jnp
from jax.experimental import pallas as pl
from jax.experimental.pallas import tpu as pltpu


def _make_nllvmf_kernel(emb_dim, reg_1, reg_2):
    """Build the per-tile kernel with all hyper-params folded as constants."""
    v = float(emb_dim) / 2.0 - 1.0
    c1 = (v + 1.0) ** 2
    c2 = v - 1.0
    c3 = (v - 1.0) ** 2

    def kernel(preds_ref, tnorm_ref, loss_ref):
        # preds_ref : (T, D) bf16/f32  predicted embeddings (token-major)
        # tnorm_ref : (T, D) bf16/f32  gathered target embeddings
        # loss_ref  : (T, 1) f32       raw per-token loss (masked in wrapper)
        preds = preds_ref[...].astype(jnp.float32)
        tnorm = tnorm_ref[...].astype(jnp.float32)

        # kappa^2 = ||preds||^2 over emb_dim; reused inside logC_m.
        # keepdims=True keeps results in the natural (T, 1) layout — no
        # (T,) -> (g, 128) relayout through the XLU.
        kappa_sq = jnp.sum(preds * preds, axis=-1, keepdims=True)   # (T, 1)
        dot = jnp.sum(tnorm * preds, axis=-1, keepdims=True)        # (T, 1)
        kappa = jnp.sqrt(kappa_sq)

        # logC_m(kappa) approximation (Kumar & Tsvetkov 2019).
        logcmk = (jnp.sqrt(c1 + kappa_sq)
                  - c2 * jnp.log(c2 + jnp.sqrt(c3 + kappa_sq)))

        loss_ref[...] = -logcmk - reg_2 * dot + reg_1 * kappa

    return kernel


def nllvmf_loss(preds_ncs, target, emb_table, *, reg_1, reg_2, pad_id,
                token_tile=None, stream_dtype=jnp.bfloat16):
    """preds_ncs: (B, D, S) float (PyTorch layout); target: (B, S) int."""
    B, D, S = preds_ncs.shape
    V, D2 = emb_table.shape
    assert D == D2
    N = B * S

    # Token-major bf16 view of preds: one fused transpose + cast pass.
    preds_tok = (jnp.transpose(preds_ncs, (0, 2, 1))
                 .reshape(N, D).astype(stream_dtype))

    # Gather only the needed embedding rows (no one-hot, no full-table matmul),
    # emitted directly in the streaming dtype.
    # NOTE: jnp.take clips out-of-range ids silently (PyTorch would error).
    ids_flat = target.reshape(N).astype(jnp.int32)
    tnorm_tok = jnp.take(emb_table, ids_flat, axis=0).astype(stream_dtype)

    # --- per-generation VMEM budget -----------------------------------------
    try:
        vmem_bytes = int(pltpu.get_tpu_info().vmem_capacity_bytes)
    except Exception:
        vmem_bytes = 64 * 1024 * 1024          # conservative (v7x per-TC)
    vmem_limit = min(int(vmem_bytes * 0.8), 110 * 1024 * 1024)

    if token_tile is None:
        # Per token row: 2 streams x 2 pipeline buffers x D x 2 B (bf16)
        #                + ~3 f32 upcast / elementwise temporaries x D x 4 B.
        bytes_per_row = 2 * 2 * D * 2 + 3 * D * 4
        budget = int(vmem_bytes * 0.45)
        token_tile = max(512, min(8192, (budget // bytes_per_row) // 512 * 512))

    if token_tile >= N:
        token_tile = N                          # single full-array tile
    else:
        token_tile = max(8, (token_tile // 8) * 8)   # sublane-aligned tiles

    # Ragged final tile is fine: Pallas clips the out-of-range output writes
    # and any garbage computed there never reaches the (N, 1) output.
    n_tiles = pl.cdiv(N, token_tile)

    kernel = _make_nllvmf_kernel(D, float(reg_1), float(reg_2))

    loss_tok = pl.pallas_call(
        kernel,
        out_shape=jax.ShapeDtypeStruct((N, 1), jnp.float32),
        grid=(n_tiles,),
        in_specs=[
            pl.BlockSpec((token_tile, D), lambda i: (i, 0)),   # preds
            pl.BlockSpec((token_tile, D), lambda i: (i, 0)),   # target emb
        ],
        out_specs=pl.BlockSpec((token_tile, 1), lambda i: (i, 0)),
        compiler_params=pltpu.CompilerParams(
            dimension_semantics=("parallel",),   # v7x: shard tiles over 2 TCs
            vmem_limit_bytes=vmem_limit,
        ),
    )(preds_tok, tnorm_tok)

    # loss[mask].mean() — tiny final reduction in JAX (denominator straight
    # from target, no per-tile count stream).
    # NOTE: NaN if every token is padding (same behavior as the PyTorch module).
    mask = ids_flat != pad_id
    loss_sum = jnp.sum(jnp.where(mask, loss_tok[:, 0], 0.0))
    return loss_sum / jnp.sum(mask, dtype=jnp.float32)


def _reference(preds_ncs, target, emb_table, *, reg_1, reg_2, pad_id):
    """Plain-JAX reference mirroring the PyTorch forward (same logcmk approx)."""
    D = preds_ncs.shape[1]
    target_norm = emb_table[target]                                  # (B, S, D)
    kappa = jnp.sqrt(jnp.sum(preds_ncs * preds_ncs, axis=1))         # (B, S)
    dot = jnp.sum(target_norm * jnp.transpose(preds_ncs, (0, 2, 1)), axis=2)
    v = D / 2.0 - 1.0
    logcmk = (jnp.sqrt((v + 1.0) ** 2 + kappa ** 2)
              - (v - 1.0) * jnp.log((v - 1.0)
                                    + jnp.sqrt((v - 1.0) ** 2 + kappa ** 2)))
    loss = -logcmk - reg_2 * dot + reg_1 * kappa
    mask = target != pad_id
    return (jnp.sum(jnp.where(mask, loss, 0.0))
            / jnp.sum(mask.astype(jnp.float32)))


if __name__ == "__main__":
    PAD_ID = 1
    REG_1 = 0.1
    REG_2 = 0.1

    def _make_case(key, B, S, D, V):
        k_emb, k_pred, k_tgt = jax.random.split(key, 3)
        emb_table = jax.random.normal(k_emb, (V, D), dtype=jnp.float32)
        preds = jax.random.normal(k_pred, (B, D, S), dtype=jnp.float32)
        target = jax.random.randint(k_tgt, (B, S), 0, V, dtype=jnp.int32)
        target = target.at[0, -1].set(PAD_ID)
        target = target.at[1, 0].set(PAD_ID)
        return preds, target, emb_table

    key = jax.random.PRNGKey(0)
    k1, k2 = jax.random.split(key)

    # ---- Case 1: small shapes, single full-array tile ----------------------
    preds, target, emb_table = _make_case(k1, B=2, S=8, D=32, V=16)

    out_bf16 = nllvmf_loss(preds, target, emb_table,
                           reg_1=REG_1, reg_2=REG_2, pad_id=PAD_ID)
    out_bf16 = jax.block_until_ready(out_bf16)

    # f32-streamed run checks the kernel math exactly against the reference.
    out_f32 = nllvmf_loss(preds, target, emb_table,
                          reg_1=REG_1, reg_2=REG_2, pad_id=PAD_ID,
                          stream_dtype=jnp.float32)
    out_f32 = jax.block_until_ready(out_f32)

    ref = _reference(preds, target, emb_table,
                     reg_1=REG_1, reg_2=REG_2, pad_id=PAD_ID)
    assert jnp.allclose(out_f32, ref, rtol=1e-5, atol=1e-5), (out_f32, ref)
    assert jnp.allclose(out_bf16, ref, rtol=1e-2, atol=1e-2), (out_bf16, ref)

    # ---- Case 2: multi-tile pipelined grid (3 tiles of 512 tokens) ---------
    preds2, target2, emb_table2 = _make_case(k2, B=2, S=768, D=64, V=64)
    out2 = nllvmf_loss(preds2, target2, emb_table2,
                       reg_1=REG_1, reg_2=REG_2, pad_id=PAD_ID,
                       token_tile=512)
    out2 = jax.block_until_ready(out2)
    ref2 = _reference(preds2, target2, emb_table2,
                      reg_1=REG_1, reg_2=REG_2, pad_id=PAD_ID)
    assert jnp.allclose(out2, ref2, rtol=1e-2, atol=1e-2), (out2, ref2)

    print("KERNEL_OK")
</pallas_src>

<mosaic_0001>
module attributes {stable_mosaic.version = 11 : i64} {
  func.func @kernel(%arg0: i32, %arg1: memref<16x32xbf16, #tpu.memory_space<vmem>>, %arg2: memref<16x32xbf16, #tpu.memory_space<vmem>>, %arg3: memref<16x1xf32, #tpu.memory_space<vmem>>) attributes {dimension_semantics = [#tpu.dimension_semantics<parallel>], iteration_bounds = array<i64: 1>, scalar_prefetch = 0 : i64, scratch_operands = 0 : i64, tpu.core_type = #tpu.core_type<tc>, window_params = [{transform_indices = @transform_0, window_bounds = array<i64: 16, 32>}, {transform_indices = @transform_1, window_bounds = array<i64: 16, 32>}, {transform_indices = @transform_2, window_bounds = array<i64: 16, 1>}]} {
    %c0 = arith.constant 0 : index
    %c0_0 = arith.constant 0 : index
    %0 = vector.load %arg1[%c0, %c0_0] : memref<16x32xbf16, #tpu.memory_space<vmem>>, vector<16x32xbf16>
    %1 = arith.extf %0 : vector<16x32xbf16> to vector<16x32xf32>
    %c0_1 = arith.constant 0 : index
    %c0_2 = arith.constant 0 : index
    %2 = vector.load %arg2[%c0_1, %c0_2] : memref<16x32xbf16, #tpu.memory_space<vmem>>, vector<16x32xbf16>
    %3 = arith.extf %2 : vector<16x32xbf16> to vector<16x32xf32>
    %4 = arith.mulf %1, %1 : vector<16x32xf32>
    %cst = arith.constant dense<0.000000e+00> : vector<16xf32>
    %5 = vector.multi_reduction <add>, %4, %cst [1] : vector<16x32xf32> to vector<16xf32>
    %6 = vector.shape_cast %5 : vector<16xf32> to vector<16x1xf32>
    %7 = arith.mulf %3, %1 : vector<16x32xf32>
    %cst_3 = arith.constant dense<0.000000e+00> : vector<16xf32>
    %8 = vector.multi_reduction <add>, %7, %cst_3 [1] : vector<16x32xf32> to vector<16xf32>
    %9 = vector.shape_cast %8 : vector<16xf32> to vector<16x1xf32>
    %10 = math.sqrt %6 : vector<16x1xf32>
    %cst_4 = arith.constant 2.560000e+02 : f32
    %11 = vector.broadcast %cst_4 : f32 to vector<16x1xf32>
    %12 = arith.addf %11, %6 : vector<16x1xf32>
    %13 = math.sqrt %12 : vector<16x1xf32>
    %cst_5 = arith.constant 1.960000e+02 : f32
    %14 = vector.broadcast %cst_5 : f32 to vector<16x1xf32>
    %15 = arith.addf %14, %6 : vector<16x1xf32>
    %16 = math.sqrt %15 : vector<16x1xf32>
    %cst_6 = arith.constant 1.400000e+01 : f32
    %17 = vector.broadcast %cst_6 : f32 to vector<16x1xf32>
    %18 = arith.addf %17, %16 : vector<16x1xf32>
    %19 = math.log %18 : vector<16x1xf32>
    %cst_7 = arith.constant 1.400000e+01 : f32
    %20 = vector.broadcast %cst_7 : f32 to vector<16x1xf32>
    %21 = arith.mulf %20, %19 : vector<16x1xf32>
    %22 = arith.subf %13, %21 : vector<16x1xf32>
    %cst_8 = arith.constant 0.000000e+00 : f32
    %23 = vector.broadcast %cst_8 : f32 to vector<16x1xf32>
    %24 = arith.subf %23, %22 : vector<16x1xf32>
    %cst_9 = arith.constant 1.000000e-01 : f32
    %25 = vector.broadcast %cst_9 : f32 to vector<16x1xf32>
    %26 = arith.mulf %25, %9 : vector<16x1xf32>
    %27 = arith.subf %24, %26 : vector<16x1xf32>
    %cst_10 = arith.constant 1.000000e-01 : f32
    %28 = vector.broadcast %cst_10 : f32 to vector<16x1xf32>
    %29 = arith.mulf %28, %10 : vector<16x1xf32>
    %30 = arith.addf %27, %29 : vector<16x1xf32>
    %c0_11 = arith.constant 0 : index
    %c0_12 = arith.constant 0 : index
    %31 = vector.load %arg3[%c0_11, %c0_12] : memref<16x1xf32, #tpu.memory_space<vmem>>, vector<16x1xf32>
    tpu.vector_store %arg3[%c0_11, %c0_12], %30 {strides = array<i32>} : memref<16x1xf32, #tpu.memory_space<vmem>>, vector<16x1xf32>,
    return
  }
  func.func @transform_0(%arg0: i32) -> (i32, i32) {
    %c0_i32 = arith.constant 0 : i32
    %c0_i32_0 = arith.constant 0 : i32
    return %arg0, %c0_i32 : i32, i32
  }
  func.func @transform_1(%arg0: i32) -> (i32, i32) {
    %c0_i32 = arith.constant 0 : i32
    %c0_i32_0 = arith.constant 0 : i32
    return %arg0, %c0_i32 : i32, i32
  }
  func.func @transform_2(%arg0: i32) -> (i32, i32) {
    %c0_i32 = arith.constant 0 : i32
    %c0_i32_0 = arith.constant 0 : i32
    return %arg0, %c0_i32 : i32, i32
  }
}

</mosaic_0001>

<bundles_post_ra>
// kernel: tpu_custom_call.1
= control target key start
LH: loop header
LB: loop body
LE: loop exit
PB: predicated region body
PF: predicated region fallthrough
CT: control target
= control target key end

     0   :  { %7 = vsyncpa [#allocation3], 0  ;;  %s326_s0 = inlined_call_operand.hbm [shape: bf16[16,32], index: 0, kind: input, shape index: {}]   ;;  %s327_s1 = inlined_call_operand.hbm [shape: bf16[16,32], index: 1, kind: input, shape index: {}]   ;;  %s328_s2 = inlined_call_operand.vmem [shape: f32[16,1], index: 2, kind: output, shape index: {}]  }
   0x1   :  { %s13_s11 = sshll.u32 %s326_s0, 4  ;;  %s14_s11 = int_to_ptr.hbm [resolvable:$true] %s13_s11 }
   0x2   :  { %8 = vsyncpa [#allocation5], 0  ;;  %s253_s12 = smov [#allocation2]   ;;  %s26_s16 = sshll.u32 %s327_s1, 4  ;;  %s27_s16 = int_to_ptr.hbm [resolvable:$true] %s26_s16 }
   0x3   :  { %s15_s13 = sshll.u32 %s253_s12, 4  ;;  %s254_s17 = smov 64   ;;  %s16_s13 = int_to_ptr.vmem [resolvable:$true] %s15_s13 }
   0x4   :  { %s255_s18 = smov 4   ;;  %s256_s19 = smov [#allocation4]  }
   0x5   :  { %21 = dma.hbm_to_vmem [thread:$0]  %s14_s11, 128, %s16_s13, [#allocation3], %s254_s17, %s254_s17, %s255_s18  }
   0x6   :  { %s28_s20 = sshll.u32 %s256_s19, 4  ;;  %s29_s20 = int_to_ptr.vmem [resolvable:$true] %s28_s20 }
   0x7   :  { %34 = dma.hbm_to_vmem [thread:$0]  %s27_s16, 128, %s29_s20, [#allocation5], %s254_s17, %s254_s17, %s255_s18  }
   0x8   :  { %249 = dma.done.wait [#allocation3], 128  }
   0x9   :  { %250 = vsyncadd [#allocation3], 4294967168 }
   0xa   :  { %251 = dma.done.wait [#allocation5], 128  }
   0xb   :  { %252 = vsyncadd [#allocation5], 4294967168  ;;  %v174_v0 = vld [vmem:[#allocation2] sm:$0xff]   ;;  %v178_v1 = vld [vmem:[#allocation4] sm:$0xff]   ;;  %vm53_vm0 = vcmask 261120   ;;  %vm164_vm10 = vcmask 7168  }
   0xc   :  { %v175_v2 = vunpack.c.l.bf16 %v174_v0  ;;  %v179_v3 = vunpack.c.l.bf16 %v178_v1  ;;  %v176_v5 = vunpack.c.h.bf16 %v174_v0  ;;  %v180_v7 = vunpack.c.h.bf16 %v178_v1 }
   0xe   :  { %v51_v4 = vmul.f32 %v175_v2, %v175_v2  ;;  %v60_v6 = vmul.f32 %v179_v3, %v175_v2  ;;  %v52_v10 = vmul.f32 %v176_v5, %v176_v5  ;;  %v61_v11 = vmul.f32 %v180_v7, %v176_v5 }
  0x10   :  { %v54_v8 = vsel %vm53_vm0, %v51_v4, 0.0  ;;  %v62_v9 = vsel %vm53_vm0, %v60_v6, 0.0  ;;  %v57_v12 = vsel %vm53_vm0, %v52_v10, 0.0  ;;  %v65_v13 = vsel %vm53_vm0, %v61_v11, 0.0 }
  0x11   :  { %55 = vadd.xlane.f32.xlu0 %v54_v8  ;;  %63 = vadd.xlane.f32.xlu1 %v62_v9 }
  0x19   :  { %58 = vadd.xlane.f32.xlu0 %v57_v12  ;;  %66 = vadd.xlane.f32.xlu1 %v65_v13 }
  0x84   :  { %v278_v14 = vpop.xlane.xlu0 %55  ;;  %v64_v2 = vpop.xlane.xlu1 %63 }
  0x85   :  { %v281_v15 = vadd.f32 256.0, %v278_v14  ;;  %v118_v16 = vadd.f32 196.0, %v278_v14  ;;  %185 = vrsqrt.f32 %v278_v14  ;;  %vm75_vm6 = vcmp.eq.f32.partialorder %v278_v14, inf }
  0x86   :  { %v78_v11 = vand.u32 2147483648, %v278_v14  ;;  %vm77_vm8 = vcmp.eq.f32.partialorder %v278_v14, 0.0 }
  0x87   :  { %187 = vrsqrt.f32 %v281_v15  ;;  %vm127_vm1 = vcmp.eq.f32.partialorder %v118_v16, inf  ;;  %v130_v43 = vand.u32 2147483648, %v118_v16  ;;  %vm129_vm2 = vcmp.eq.f32.partialorder %v118_v16, 0.0 }
  0x88   :  { %189 = vrsqrt.f32 %v118_v16  ;;  %vm101_vm5 = vcmp.eq.f32.partialorder %v281_v15, inf  ;;  %v104_v7 = vand.u32 2147483648, %v281_v15  ;;  %vm103_vm7 = vcmp.eq.f32.partialorder %v281_v15, 0.0 }
  0x8b   :  { %v186_v17 = vpop.eup %185 }
  0x8c   :  { %v286_v18 = vpop.xlane.xlu0 %58  ;;  %v69_v25 = vmul.f32 %v186_v17, %v278_v14 }
  0x8d   :  { %v188_v19 = vpop.eup %187  ;;  %v289_v20 = vadd.f32 256.0, %v286_v18  ;;  %v119_v21 = vadd.f32 196.0, %v286_v18  ;;  %191 = vrsqrt.f32 %v286_v18  ;;  %vm87_vm11 = vcmp.eq.f32.partialorder %v286_v18, inf }
  0x8e   :  { %v190_v22 = vpop.eup %189  ;;  %v95_v23 = vmul.f32 %v188_v19, %v281_v15  ;;  %v70_v30 = vmul.f32 %v186_v17, %v69_v25  ;;  %vm89_vm13 = vcmp.eq.f32.partialorder %v286_v18, 0.0 }
  0x8f   :  { %v121_v24 = vmul.f32 %v190_v22, %v118_v16  ;;  %193 = vrsqrt.f32 %v289_v20  ;;  %vm139_vm3 = vcmp.eq.f32.partialorder %v119_v21, inf  ;;  %v142_v60 = vand.u32 2147483648, %v119_v21 }
  0x90   :  { %195 = vrsqrt.f32 %v119_v21  ;;  %v96_v27 = vmul.f32 %v188_v19, %v95_v23  ;;  %v71_v38 = vmul.f32 0.5, %v70_v30  ;;  %vm141_vm4 = vcmp.eq.f32.partialorder %v119_v21, 0.0 }
  0x91   :  { %v122_v26 = vmul.f32 %v190_v22, %v121_v24  ;;  %vm113_vm9 = vcmp.eq.f32.partialorder %v289_v20, inf  ;;  %vm115_vm12 = vcmp.eq.f32.partialorder %v289_v20, 0.0 }
  0x92   :  { %v97_v34 = vmul.f32 0.5, %v96_v27  ;;  %v72_v47 = vsub.f32 1.5, %v71_v38  ;;  %v67_v27 = vpop.xlane.xlu1 %66 }
  0x93   :  { %v123_v28 = vmul.f32 0.5, %v122_v26  ;;  %v192_v29 = vpop.eup %191 }
  0x94   :  { %v81_v39 = vmul.f32 %v192_v29, %v286_v18  ;;  %v98_v42 = vsub.f32 1.5, %v97_v34  ;;  %v73_v55 = vmul.f32 %v186_v17, %v72_v47  ;;  %v157_v34 = vmul.f32 0.1, %v67_v27 }
  0x95   :  { %v194_v31 = vpop.eup %193  ;;  %v124_v32 = vsub.f32 1.5, %v123_v28 }
  0x96   :  { %v196_v33 = vpop.eup %195  ;;  %v107_v35 = vmul.f32 %v194_v31, %v289_v20  ;;  %v82_v49 = vmul.f32 %v192_v29, %v81_v39  ;;  %v99_v52 = vmul.f32 %v188_v19, %v98_v42  ;;  %v74_v62 = vmul.f32 %v73_v55, %v278_v14 }
  0x97   :  { %v125_v36 = vmul.f32 %v190_v22, %v124_v32  ;;  %v133_v37 = vmul.f32 %v196_v33, %v119_v21 }
  0x98   :  { %v108_v44 = vmul.f32 %v194_v31, %v107_v35  ;;  %v83_v56 = vmul.f32 0.5, %v82_v49  ;;  %v100_v58 = vmul.f32 %v99_v52, %v281_v15  ;;  %v76_v8 = vsel %vm75_vm6, %v278_v14, %v74_v62 }
  0x99   :  { %v126_v40 = vmul.f32 %v125_v36, %v118_v16  ;;  %v134_v41 = vmul.f32 %v196_v33, %v133_v37  ;;  %v79_v19 = vsel %vm77_vm8, %v78_v11, %v76_v8  ;;  %v116_v14 = vand.u32 2147483648, %v289_v20 }
  0x9a   :  { %v109_v53 = vmul.f32 0.5, %v108_v44  ;;  %v84_v63 = vsub.f32 1.5, %v83_v56  ;;  %v102_v4 = vsel %vm101_vm5, %v281_v15, %v100_v58  ;;  %v160_v15 = vmul.f32 0.1, %v79_v19 }
  0x9b   :  { %v128_v45 = vsel %vm127_vm1, %v118_v16, %v126_v40  ;;  %v135_v46 = vmul.f32 0.5, %v134_v41  ;;  %v105_v12 = vsel %vm103_vm7, %v104_v7, %v102_v4  ;;  %v156_v16 = vmul.f32 0.1, %v64_v2 }
  0x9c   :  { %v131_v48 = vsel %vm129_vm2, %v130_v43, %v128_v45  ;;  %v110_v59 = vsub.f32 1.5, %v109_v53  ;;  %v85_v10 = vmul.f32 %v192_v29, %v84_v63 }
  0x9d   :  { %v144_v50 = vadd.f32 14.0, %v131_v48  ;;  %v136_v51 = vsub.f32 1.5, %v135_v46 }
  0x9e   :  { %v111_v6 = vmul.f32 %v194_v31, %v110_v59  ;;  %v86_v22 = vmul.f32 %v85_v10, %v286_v18  ;;  %v90_v31 = vand.u32 2147483648, %v286_v18 }
  0x9f   :  { %197 = vlog2.f32 %v144_v50  ;;  %v137_v54 = vmul.f32 %v196_v33, %v136_v51 }
  0xa0   :  { %v112_v17 = vmul.f32 %v111_v6, %v289_v20  ;;  %v88_v29 = vsel %vm87_vm11, %v286_v18, %v86_v22 }
  0xa1   :  { %v138_v57 = vmul.f32 %v137_v54, %v119_v21  ;;  %v91_v35 = vsel %vm89_vm13, %v90_v31, %v88_v29 }
  0xa2   :  { %v114_v25 = vsel %vm113_vm9, %v289_v20, %v112_v17  ;;  %v161_v38 = vmul.f32 0.1, %v91_v35 }
  0xa3   :  { %v140_v61 = vsel %vm139_vm3, %v119_v21, %v138_v57  ;;  %v117_v32 = vsel %vm115_vm12, %v116_v14, %v114_v25 }
  0xa4   :  { %v143_v0 = vsel %vm141_vm4, %v142_v60, %v140_v61 }
  0xa5   :  { %v198_v1 = vpop.eup %197  ;;  %v145_v3 = vadd.f32 14.0, %v143_v0 }
  0xa6   :  { %v147_v5 = vmul.f32 0.6931472, %v198_v1 }
  0xa7   :  { %199 = vlog2.f32 %v145_v3 }
  0xa8   :  { %v150_v9 = vmul.f32 14.0, %v147_v5 }
  0xaa   :  { %v152_v13 = vsub.f32 %v105_v12, %v150_v9 }
  0xac   :  { %v154_v21 = vsub.f32 0.0, %v152_v13 }
  0xad   :  { %v200_v23 = vpop.eup %199 }
  0xae   :  { %v158_v24 = vsub.f32 %v154_v21, %v156_v16  ;;  %v149_v26 = vmul.f32 0.6931472, %v200_v23 }
  0xb0   :  { %v162_v28 = vadd.f32 %v160_v15, %v158_v24  ;;  %v151_v30 = vmul.f32 14.0, %v149_v26 }
  0xb2   :  { %165 = vst.msk [vmem:[%s328_s2] sm:$0xff] %vm164_vm10, %v162_v28  ;;  %v153_v33 = vsub.f32 %v117_v32, %v151_v30 }
  0xb4   :  { %v155_v36 = vsub.f32 0.0, %v153_v33 }
  0xb6   :  { %v159_v37 = vsub.f32 %v155_v36, %v157_v34 }
  0xb8   :  { %v163_v39 = vadd.f32 %v161_v38, %v159_v37 }
  0xba   :  { %166 = vst.msk [vmem:[%s328_s2 + $0x8] sm:$0xff] %vm164_vm10, %v163_v39 }
  0xbb   :  { %171 = vsyncpa [#allocation3], 1 }
  0xbc   :  { %172 = vsyncpa [#allocation5], 1 }

</bundles_post_ra>
